<compile_context>
chip_gen: v7x
topology: tpu7x:2x2x1
jax: 0.10.0
libtpu: 0.0.40
codegen_flags: <defaults>
</compile_context>

<pallas_src>
import jax
import jax.numpy as jnp
from jax.experimental import pallas as pl
from jax.experimental.pallas import tpu as pltpu

D_IN = 768     # BERT hidden size
D_MID = 60     # fc_seqn output features
D_OUT = 1      # final logit


def _round_up(x, m):
    return ((x + m - 1) // m) * m


def _tb_max():
    # Per-generation batch-tile cap: double-buffered bf16 cls tile must stay
    # inside the scoped-VMEM default (16 MiB on v5e, 32 MiB on v6e/v7x).
    #   v5e : 2048 rows -> 2 x 3 MiB     v6e/v7x : 4096 rows -> 2 x 6 MiB
    try:
        kind = jax.devices()[0].device_kind.lower()
    except Exception:
        return 2048
    if "v5" in kind:
        return 2048
    return 4096


TB_MAX = _tb_max()


def head_kernel(x_ref, w1_ref, b1_ref, w2_ref, b2_ref, out_ref):
    # x_ref : (TB, 768) bf16      w1_ref: (768, 60) bf16
    # b1_ref: (1, 60)   f32       w2_ref: (1, 60)   f32     b2_ref: (1, 1) f32
    # out_ref: (1, 1, TB) f32     (lane-dense: batch on the lane axis)

    # fc_seqn[0]: Linear(768 -> 60) on the MXU, bf16 streams, f32 accumulation.
    h = jnp.dot(x_ref[...], w1_ref[...], preferred_element_type=jnp.float32)
    # bias + ReLU on the VPU in f32.
    h = jnp.maximum(h + b1_ref[...], 0.0)
    # fc_seqn[2]: Dropout(0.5) -> identity in eval / inference mode.
    # TODO(synk): training-mode dropout (pltpu.prng_random_bits mask) not emitted.

    # out: Linear(60 -> 1).  K=60 / N=1 is a degenerate MXU shape, so compute
    # it as a VPU multiply + lane reduction.
    y = jnp.sum(h * w2_ref[...], axis=-1, keepdims=True) + b2_ref[...]   # (TB, 1)

    # Numerically stable sigmoid: exp of a non-positive argument (EUP slot),
    # never overflows for very negative logits.
    z = jnp.exp(-jnp.abs(y))
    r = 1.0 / (1.0 + z)
    res = jnp.where(y >= 0.0, r, 1.0 - r)                                # (TB, 1)

    # Lane-dense store: relayout the tiny (TB,1) result to (1,TB) so the
    # output block stores unmasked (XLU relayout cost is negligible vs. the
    # 768-wide input DMA) and the output VMEM buffer is not lane-padded.
    out_ref[...] = res.T[None, :, :]                                     # (1,1,TB)


def head_forward(cls_bf16, w1_bf16, b1, w2_row, b2):
    """fc_seqn -> out -> sigmoid for cls of shape [B, 768]."""
    B = cls_bf16.shape[0]
    if cls_bf16.dtype != jnp.bfloat16:
        # Producer normally emits bf16 already; under jit this fuses away.
        cls_bf16 = cls_bf16.astype(jnp.bfloat16)

    # Adaptive batch tile:
    #  * small batch  -> a single tile rounded to 16 (bf16 sublane packing);
    #  * larger batch -> at least 2 grid steps (uses both v7x TensorCores via
    #    the "parallel" grid axis), rounded to 128 so the lane-dense output
    #    block stores unmasked, capped per generation for VMEM.
    if B <= 256:
        tb = _round_up(B, 16)
    else:
        tb = min(TB_MAX, _round_up(-(-B // 2), 128))
    n_tiles = pl.cdiv(B, tb)
    b_pad = n_tiles * tb
    if b_pad != B:
        cls_bf16 = jnp.pad(cls_bf16, ((0, b_pad - B), (0, 0)))

    out_rows = pl.pallas_call(
        head_kernel,
        out_shape=jax.ShapeDtypeStruct((n_tiles, 1, tb), jnp.float32),
        grid_spec=pltpu.PrefetchScalarGridSpec(
            num_scalar_prefetch=0,
            grid=(n_tiles,),
            in_specs=[
                pl.BlockSpec((tb, D_IN), lambda i: (i, 0)),      # cls tile (bf16)
                pl.BlockSpec((D_IN, D_MID), lambda i: (0, 0)),   # W1 (resident, bf16)
                pl.BlockSpec((1, D_MID), lambda i: (0, 0)),      # b1
                pl.BlockSpec((1, D_MID), lambda i: (0, 0)),      # W2 row
                pl.BlockSpec((1, D_OUT), lambda i: (0, 0)),      # b2
            ],
            out_specs=pl.BlockSpec((1, 1, tb), lambda i: (i, 0, 0)),
        ),
        compiler_params=pltpu.CompilerParams(
            dimension_semantics=("parallel",)),
    )(cls_bf16, w1_bf16, b1, w2_row, b2)

    # (n_tiles, 1, tb) -> (B, 1); padded rows are sliced off.
    return out_rows.reshape(-1)[:B].reshape(B, D_OUT)


# ---------------- plain-JAX glue: stub BERT + parameter init ----------------

def stub_bert(word, attention, embed_table, n_heads=12):
    """Deterministic stand-in for the external BERT backbone.

    Returns (cls, atten) analogous to `_, cls, _, atten = BERT(...)`.
    cls is emitted directly in bf16 so the cast fuses with the pooling
    (no standalone HBM pass in front of the head kernel).
    """
    emb = embed_table[word]                                # [B, S, 768]
    mask = attention.astype(jnp.float32)[..., None]        # [B, S, 1]
    denom = jnp.maximum(mask.sum(axis=1), 1.0)             # [B, 1]
    cls = ((emb * mask).sum(axis=1) / denom).astype(jnp.bfloat16)   # [B, 768] bf16
    B, S = word.shape
    atten = jnp.broadcast_to(
        (attention.astype(jnp.float32) / jnp.maximum(
            attention.sum(axis=-1, keepdims=True).astype(jnp.float32), 1.0)
         )[:, None, None, :],
        (B, n_heads, S, S))                                # dummy attention maps
    return cls, atten


def init_params(key):
    k1, k2, k3, k4 = jax.random.split(key, 4)
    # PyTorch Linear default init ~ U(-1/sqrt(fan_in), 1/sqrt(fan_in))
    lim1 = 1.0 / (D_IN ** 0.5)
    lim2 = 1.0 / (D_MID ** 0.5)
    # W1 stored pre-transposed [in, out] and cast to bf16 ONCE here (not per call).
    w1 = jax.random.uniform(k1, (D_IN, D_MID), jnp.float32, -lim1, lim1
                            ).astype(jnp.bfloat16)
    b1 = jax.random.uniform(k2, (1, D_MID), jnp.float32, -lim1, lim1)
    w2 = jax.random.uniform(k3, (1, D_MID), jnp.float32, -lim2, lim2)   # out.weight (1,60)
    b2 = jax.random.uniform(k4, (1, D_OUT), jnp.float32, -lim2, lim2)
    # note: self.fc1 = Linear(768, 512) is defined but never used in forward(); omitted.
    return w1, b1, w2, b2


@jax.jit
def architecture_forward(word, attention, embed_table, params):
    cls, atten = stub_bert(word, attention, embed_table)
    x = head_forward(cls, *params)        # Pallas kernel: fc_seqn -> out -> sigmoid
    return x, atten


if __name__ == "__main__":
    key = jax.random.PRNGKey(0)
    kp, ke, kw, ka = jax.random.split(key, 4)

    B, S, VOCAB = 8, 16, 1000
    params = init_params(kp)
    embed_table = jax.random.normal(ke, (VOCAB, D_IN), jnp.float32) * 0.02
    word = jax.random.randint(kw, (B, S), 0, VOCAB, dtype=jnp.int32)
    attention = (jax.random.uniform(ka, (B, S)) > 0.2).astype(jnp.int32)

    out, atten = architecture_forward(word, attention, embed_table, params)
    jax.block_until_ready(out)
    jax.block_until_ready(atten)

    # correctness check against a pure-JAX reference of the head
    # (cls / W1 are bf16-rounded to mirror the kernel's streaming precision)
    cls_bf, _ = stub_bert(word, attention, embed_table)
    w1, b1, w2, b2 = params
    cls_q = cls_bf.astype(jnp.float32)
    w1_q = w1.astype(jnp.float32)
    h_ref = jnp.maximum(cls_q @ w1_q + b1, 0.0)
    ref = jax.nn.sigmoid(jnp.sum(h_ref * w2, axis=-1, keepdims=True) + b2)

    assert out.shape == (B, 1)
    assert atten.shape == (B, 12, S, S)
    assert jnp.allclose(out, ref, atol=2e-3, rtol=2e-3)

    print("KERNEL_OK")
</pallas_src>

<mosaic_0001>
module attributes {stable_mosaic.version = 11 : i64} {
  func.func @head_kernel(%arg0: i32, %arg1: memref<16x768xbf16, #tpu.memory_space<vmem>>, %arg2: memref<768x60xbf16, #tpu.memory_space<vmem>>, %arg3: memref<1x60xf32, #tpu.memory_space<vmem>>, %arg4: memref<1x60xf32, #tpu.memory_space<vmem>>, %arg5: memref<1x1xf32, #tpu.memory_space<vmem>>, %arg6: memref<1x1x16xf32, #tpu.memory_space<vmem>>) attributes {dimension_semantics = [#tpu.dimension_semantics<parallel>], iteration_bounds = array<i64: 1>, scalar_prefetch = 0 : i64, scratch_operands = 0 : i64, tpu.core_type = #tpu.core_type<tc>, window_params = [{transform_indices = @transform_0, window_bounds = array<i64: 16, 768>}, {pipeline_mode = #tpu.pipeline_mode<synchronous>, transform_indices = @transform_1, window_bounds = array<i64: 768, 60>}, {pipeline_mode = #tpu.pipeline_mode<synchronous>, transform_indices = @transform_2, window_bounds = array<i64: 1, 60>}, {pipeline_mode = #tpu.pipeline_mode<synchronous>, transform_indices = @transform_3, window_bounds = array<i64: 1, 60>}, {pipeline_mode = #tpu.pipeline_mode<synchronous>, transform_indices = @transform_4, window_bounds = array<i64: 1, 1>}, {transform_indices = @transform_5, window_bounds = array<i64: 1, 1, 16>}]} {
    %c0 = arith.constant 0 : index
    %c0_0 = arith.constant 0 : index
    %0 = vector.load %arg1[%c0, %c0_0] : memref<16x768xbf16, #tpu.memory_space<vmem>>, vector<16x768xbf16>
    %c0_1 = arith.constant 0 : index
    %c0_2 = arith.constant 0 : index
    %1 = vector.load %arg2[%c0_1, %c0_2] : memref<768x60xbf16, #tpu.memory_space<vmem>>, vector<768x60xbf16>
    %cst = arith.constant dense<0.000000e+00> : vector<16x60xf32>
    %2 = tpu.matmul %0, %1, %cst {dimension_numbers = #tpu.dot_dimension_numbers<[1], [0], [0], [1], [0, 0, 1, 1], [], []>} : vector<16x768xbf16>, vector<768x60xbf16>, vector<16x60xf32> -> vector<16x60xf32>
    %c0_3 = arith.constant 0 : index
    %c0_4 = arith.constant 0 : index
    %3 = vector.load %arg3[%c0_3, %c0_4] : memref<1x60xf32, #tpu.memory_space<vmem>>, vector<1x60xf32>
    %4 = vector.broadcast %3 : vector<1x60xf32> to vector<16x60xf32>
    %5 = arith.addf %2, %4 : vector<16x60xf32>
    %cst_5 = arith.constant 0.000000e+00 : f32
    %6 = vector.broadcast %cst_5 : f32 to vector<16x60xf32>
    %7 = arith.maximumf %5, %6 : vector<16x60xf32>
    %c0_6 = arith.constant 0 : index
    %c0_7 = arith.constant 0 : index
    %8 = vector.load %arg4[%c0_6, %c0_7] : memref<1x60xf32, #tpu.memory_space<vmem>>, vector<1x60xf32>
    %9 = vector.broadcast %8 : vector<1x60xf32> to vector<16x60xf32>
    %10 = arith.mulf %7, %9 : vector<16x60xf32>
    %cst_8 = arith.constant dense<0.000000e+00> : vector<16xf32>
    %11 = vector.multi_reduction <add>, %10, %cst_8 [1] : vector<16x60xf32> to vector<16xf32>
    %12 = vector.shape_cast %11 : vector<16xf32> to vector<16x1xf32>
    %c0_9 = arith.constant 0 : index
    %c0_10 = arith.constant 0 : index
    %13 = vector.load %arg5[%c0_9, %c0_10] : memref<1x1xf32, #tpu.memory_space<vmem>>, vector<1x1xf32>
    %14 = vector.broadcast %13 : vector<1x1xf32> to vector<16x1xf32>
    %15 = arith.addf %12, %14 : vector<16x1xf32>
    %16 = math.absf %15 : vector<16x1xf32>
    %cst_11 = arith.constant 0.000000e+00 : f32
    %17 = vector.broadcast %cst_11 : f32 to vector<16x1xf32>
    %18 = arith.subf %17, %16 : vector<16x1xf32>
    %19 = math.exp %18 : vector<16x1xf32>
    %cst_12 = arith.constant 1.000000e+00 : f32
    %20 = vector.broadcast %cst_12 : f32 to vector<16x1xf32>
    %21 = arith.addf %20, %19 : vector<16x1xf32>
    %cst_13 = arith.constant 1.000000e+00 : f32
    %22 = vector.broadcast %cst_13 : f32 to vector<16x1xf32>
    %23 = arith.divf %22, %21 : vector<16x1xf32>
    %cst_14 = arith.constant 0.000000e+00 : f32
    %24 = vector.broadcast %cst_14 : f32 to vector<16x1xf32>
    %25 = arith.cmpf oge, %15, %24 : vector<16x1xf32>
    %cst_15 = arith.constant 1.000000e+00 : f32
    %26 = vector.broadcast %cst_15 : f32 to vector<16x1xf32>
    %27 = arith.subf %26, %23 : vector<16x1xf32>
    %28 = arith.select %25, %23, %27 : vector<16x1xi1>, vector<16x1xf32>
    %29 = tpu.transpose %28, [1, 0] : vector<16x1xf32> -> vector<1x16xf32>
    %30 = vector.shape_cast %29 : vector<1x16xf32> to vector<1x1x16xf32>
    %c0_16 = arith.constant 0 : index
    %c0_17 = arith.constant 0 : index
    %c0_18 = arith.constant 0 : index
    %31 = vector.load %arg6[%c0_16, %c0_17, %c0_18] : memref<1x1x16xf32, #tpu.memory_space<vmem>>, vector<1x1x16xf32>
    tpu.vector_store %arg6[%c0_16, %c0_17, %c0_18], %30 {strides = array<i32>} : memref<1x1x16xf32, #tpu.memory_space<vmem>>, vector<1x1x16xf32>,
    return
  }
  func.func @transform_0(%arg0: i32) -> (i32, i32) {
    %c0_i32 = arith.constant 0 : i32
    %c0_i32_0 = arith.constant 0 : i32
    return %arg0, %c0_i32 : i32, i32
  }
  func.func @transform_1(%arg0: i32) -> (i32, i32) {
    %c0_i32 = arith.constant 0 : i32
    %c0_i32_0 = arith.constant 0 : i32
    %c0_i32_1 = arith.constant 0 : i32
    return %c0_i32, %c0_i32_0 : i32, i32
  }
  func.func @transform_2(%arg0: i32) -> (i32, i32) {
    %c0_i32 = arith.constant 0 : i32
    %c0_i32_0 = arith.constant 0 : i32
    %c0_i32_1 = arith.constant 0 : i32
    return %c0_i32, %c0_i32_0 : i32, i32
  }
  func.func @transform_3(%arg0: i32) -> (i32, i32) {
    %c0_i32 = arith.constant 0 : i32
    %c0_i32_0 = arith.constant 0 : i32
    %c0_i32_1 = arith.constant 0 : i32
    return %c0_i32, %c0_i32_0 : i32, i32
  }
  func.func @transform_4(%arg0: i32) -> (i32, i32) {
    %c0_i32 = arith.constant 0 : i32
    %c0_i32_0 = arith.constant 0 : i32
    %c0_i32_1 = arith.constant 0 : i32
    return %c0_i32, %c0_i32_0 : i32, i32
  }
  func.func @transform_5(%arg0: i32) -> (i32, i32, i32) {
    %c0_i32 = arith.constant 0 : i32
    %c0_i32_0 = arith.constant 0 : i32
    %c0_i32_1 = arith.constant 0 : i32
    return %arg0, %c0_i32, %c0_i32_0 : i32, i32, i32
  }
}

</mosaic_0001>

<bundles_post_ra>
// kernel: architecture_forward.1
= control target key start
LH: loop header
LB: loop body
LE: loop exit
PB: predicated region body
PF: predicated region fallthrough
CT: control target
= control target key end

     0   :  { %vm584_vm0 = vcmask 490496   ;;  %vm652_vm3 = vcmask 122880   ;;  %s1051_s1 = inlined_call_operand.vmem [shape: bf16[768,60], index: 1, kind: input, shape index: {}]   ;;  %s1052_s0 = inlined_call_operand.vmem [shape: bf16[16,768], index: 0, kind: input, shape index: {}]   ;;  %s1053_s4 = inlined_call_operand.<no memory space> [shape: f32[1,1], index: 4, kind: input, shape index: {}]   ;;  %s1054_s2 = inlined_call_operand.vmem [shape: f32[1,60], index: 2, kind: input, shape index: {}]   ;;  %s1055_s3 = inlined_call_operand.vmem [shape: f32[1,60], index: 3, kind: input, shape index: {}]   ;;  %s1056_s5 = inlined_call_operand.vmem [shape: f32[1,1,16], index: 5, kind: output, shape index: {}]  }
   0x1   :  { %v782_v0 = vld [vmem:[%s1051_s1 + $0x40] sm:$0xff]   ;;  %v786_v4 = vld [vmem:[%s1051_s1 + $0x48] sm:$0xff]   ;;  %v790_v8 = vld [vmem:[%s1051_s1 + $0x50] sm:$0xff]   ;;  %v10_v54 = vstv %s1053_s4 }
   0x2   :  { %v783_v1 = vld [vmem:[%s1051_s1] sm:$0xff]   ;;  %715 = vmatprep.subr.bf16.mxu0 %v782_v0  ;;  %v787_v5 = vld [vmem:[%s1051_s1 + $0x8] sm:$0xff]   ;;  %v791_v9 = vld [vmem:[%s1051_s1 + $0x10] sm:$0xff]   ;;  %11 = vst [vmem:[#allocation2] sm:$0x1] %v10_v54 }
   0x3   :  { %v784_v2 = vld [vmem:[%s1051_s1 + $0xc0] sm:$0xff]   ;;  %716 = vmatpush3.bf16.msra.mxu0 %v783_v1  ;;  %v788_v6 = vld [vmem:[%s1051_s1 + $0xc8] sm:$0xff]   ;;  %v792_v10 = vld [vmem:[%s1051_s1 + $0xd0] sm:$0xff]  }
   0x4   :  { %v785_v3 = vld [vmem:[%s1051_s1 + $0x80] sm:$0xff]   ;;  %737 = vmatprep.subr.bf16.mxu1 %v784_v2  ;;  %717 = vmatprep.subr.bf16.mxu0 %v786_v4  ;;  %v789_v7 = vld [vmem:[%s1051_s1 + $0x88] sm:$0xff]   ;;  %v793_v11 = vld [vmem:[%s1051_s1 + $0x90] sm:$0xff]  }
   0x5   :  { %738 = vmatpush3.bf16.msra.mxu1 %v785_v3  ;;  %v794_v12 = vld [vmem:[%s1051_s1 + $0x58] sm:$0xff]   ;;  %v798_v16 = vld [vmem:[%s1051_s1 + $0x60] sm:$0xff]   ;;  %v802_v20 = vld [vmem:[%s1051_s1 + $0x68] sm:$0xff]  }
   0x6   :  { %739 = vmatprep.subr.bf16.mxu1 %v788_v6  ;;  %v795_v13 = vld [vmem:[%s1051_s1 + $0x18] sm:$0xff]   ;;  %v799_v17 = vld [vmem:[%s1051_s1 + $0x20] sm:$0xff]   ;;  %v803_v21 = vld [vmem:[%s1051_s1 + $0x28] sm:$0xff]  }
   0x7   :  { %718 = vmatpush3.bf16.msra.mxu0 %v787_v5  ;;  %v796_v14 = vld [vmem:[%s1051_s1 + $0xd8] sm:$0xff]   ;;  %v800_v18 = vld [vmem:[%s1051_s1 + $0xe0] sm:$0xff]   ;;  %v804_v22 = vld [vmem:[%s1051_s1 + $0xe8] sm:$0xff]  }
   0x8   :  { %719 = vmatprep.subr.bf16.mxu0 %v790_v8  ;;  %v797_v15 = vld [vmem:[%s1051_s1 + $0x98] sm:$0xff]   ;;  %v801_v19 = vld [vmem:[%s1051_s1 + $0xa0] sm:$0xff]   ;;  %v805_v23 = vld [vmem:[%s1051_s1 + $0xa8] sm:$0xff]  }
   0x9   :  { %740 = vmatpush3.bf16.msra.mxu1 %v789_v7  ;;  %v806_v24 = vld [vmem:[%s1051_s1 + $0x70] sm:$0xff]   ;;  %v810_v28 = vld [vmem:[%s1051_s1 + $0x78] sm:$0xff]   ;;  %v817_v34 = vld [vmem:[%s1051_s1 + $0x140] sm:$0xff]  }
   0xa   :  { %741 = vmatprep.subr.bf16.mxu1 %v792_v10  ;;  %v807_v25 = vld [vmem:[%s1051_s1 + $0x30] sm:$0xff]   ;;  %v811_v29 = vld [vmem:[%s1051_s1 + $0x38] sm:$0xff]   ;;  %v818_v35 = vld [vmem:[%s1052_s0 + $0x8] ss:$24 sps:$4 sm:$0xff]  }
   0xb   :  { %720 = vmatpush3.bf16.msra.mxu0 %v791_v9  ;;  %v808_v26 = vld [vmem:[%s1051_s1 + $0xf0] sm:$0xff]   ;;  %v812_v30 = vld [vmem:[%s1051_s1 + $0xf8] sm:$0xff]   ;;  %v820_v36 = vld [vmem:[%s1052_s0 + $0xc] ss:$24 sps:$4 sm:$0xff]  }
   0xc   :  { %721 = vmatprep.subr.bf16.mxu0 %v794_v12  ;;  %v809_v27 = vld [vmem:[%s1051_s1 + $0xb0] sm:$0xff]   ;;  %v813_v31 = vld [vmem:[%s1052_s0] ss:$24 sps:$4 sm:$0xff]   ;;  %v815_v32 = vld [vmem:[%s1052_s0 + $0x4] ss:$24 sps:$4 sm:$0xff]   ;;  %523 = vmatprep.mubr.bf16.mxu1 %v820_v36 }
   0xd   :  { %742 = vmatpush3.bf16.msra.mxu1 %v793_v11  ;;  %v816_v33 = vld [vmem:[%s1051_s1 + $0xb8] sm:$0xff]   ;;  %482 = vmatprep.mubr.bf16.mxu0 %v815_v32  ;;  %v821_v37 = vld [vmem:[%s1051_s1 + $0x100] sm:$0xff]   ;;  %v822_v38 = vld [vmem:[%s1051_s1 + $0x148] sm:$0xff]  }
   0xe   :  { %743 = vmatprep.subr.bf16.mxu1 %v796_v14  ;;  %v823_v39 = vld [vmem:[%s1051_s1 + $0x108] sm:$0xff]   ;;  %v824_v40 = vld [vmem:[%s1051_s1 + $0x150] sm:$0xff]   ;;  %v826_v42 = vld [vmem:[%s1051_s1 + $0x158] sm:$0xff]  }
   0xf   :  { %722 = vmatpush3.bf16.msra.mxu0 %v795_v13  ;;  %v825_v41 = vld [vmem:[%s1051_s1 + $0x110] sm:$0xff]   ;;  %v827_v43 = vld [vmem:[%s1051_s1 + $0x118] sm:$0xff]   ;;  %v828_v44 = vld [vmem:[%s1051_s1 + $0x160] sm:$0xff]  }
  0x10   :  { %723 = vmatprep.subr.bf16.mxu0 %v798_v16  ;;  %v829_v45 = vld [vmem:[%s1051_s1 + $0x120] sm:$0xff]   ;;  %v830_v46 = vld [vmem:[%s1051_s1 + $0x168] sm:$0xff]   ;;  %v832_v49 = vld [vmem:[%s1051_s1 + $0x170] sm:$0xff]  }
  0x11   :  { %744 = vmatpush3.bf16.msra.mxu1 %v797_v15  ;;  %v838_v47 = vld [vmem:[%s1052_s0 + $0x14] ss:$24 sps:$4 sm:$0xff]   ;;  %v834_v51 = vld [vmem:[%s1051_s1 + $0x178] sm:$0xff]   ;;  %v836_v53 = vld [vmem:[%s1052_s0 + $0x10] ss:$24 sps:$4 sm:$0xff]  }
  0x12   :  { %745 = vmatprep.subr.bf16.mxu1 %v800_v18  ;;  %v831_v48 = vld [vmem:[%s1051_s1 + $0x128] sm:$0xff]   ;;  %v833_v50 = vld [vmem:[%s1051_s1 + $0x130] sm:$0xff]   ;;  %v835_v52 = vld [vmem:[%s1051_s1 + $0x138] sm:$0xff]  }
  0x13   :  { %724 = vmatpush3.bf16.msra.mxu0 %v799_v17  ;;  %v658_v56 = vld [vmem:[%s1054_s2] ss:$0 sm:$0xff] }
  0x14   :  { %725 = vmatprep.subr.bf16.mxu0 %v802_v20  ;;  %v713_v15 = vld [vmem:[%s1055_s3] ss:$0 sm:$0xff] }
  0x15   :  { %746 = vmatpush3.bf16.msra.mxu1 %v801_v19 }
  0x16   :  { %747 = vmatprep.subr.bf16.mxu1 %v804_v22 }
  0x17   :  { %726 = vmatpush3.bf16.msra.mxu0 %v803_v21 }
  0x18   :  { %727 = vmatprep.subr.bf16.mxu0 %v806_v24 }
  0x19   :  { %748 = vmatpush3.bf16.msra.mxu1 %v805_v23  ;;  %v714_v23 = vld [vmem:[#allocation2] ss:$0 sm:$0xff] }
  0x1a   :  { %749 = vmatprep.subr.bf16.mxu1 %v808_v26 }
  0x1b   :  { %728 = vmatpush3.bf16.msra.mxu0 %v807_v25 }
  0x1c   :  { %729 = vmatprep.subr.bf16.mxu0 %v810_v28 }
  0x1d   :  { %750 = vmatpush3.bf16.msra.mxu1 %v809_v27 }
  0x1e   :  { %751 = vmatprep.subr.bf16.mxu1 %v812_v30 }
  0x1f   :  { %730 = vmatpush3.bf16.msra.mxu0 %v811_v29 }
  0x20   :  { %759 = vmatprep.subr.bf16.mxu0 %v817_v34 }
  0x21   :  { %752 = vmatpush3.bf16.msra.mxu1 %v816_v33 }
  0x22   :  { %483 = vmatmul.mubr.bf16.vlgmr.msra.gmra.mrb[0].mxu0 %v813_v31 }
  0x23   :  { %760 = vmatpush3.bf16.msra.mxu0 %v821_v37  ;;  %564 = vmatprep.mubr.bf16.mxu0 %v838_v47 }
  0x24   :  { %524 = vmatmul.mubr.bf16.vlgmr.msra.gmra.mrb[0].mxu1 %v818_v35  ;;  %761 = vmatprep.subr.bf16.mxu0 %v822_v38 }
  0x27   :  { %762 = vmatpush3.bf16.msra.mxu0 %v823_v39 }
  0x28   :  { %763 = vmatprep.subr.bf16.mxu0 %v824_v40 }
  0x2b   :  { %764 = vmatpush3.bf16.msra.mxu0 %v825_v41 }
  0x2c   :  { %765 = vmatprep.subr.bf16.mxu0 %v826_v42 }
  0x2f   :  { %766 = vmatpush3.bf16.msra.mxu0 %v827_v43 }
  0x30   :  { %767 = vmatprep.subr.bf16.mxu0 %v828_v44 }
  0x33   :  { %768 = vmatpush3.bf16.msra.mxu0 %v829_v45 }
  0x34   :  { %769 = vmatprep.subr.bf16.mxu0 %v830_v46 }
  0x37   :  { %770 = vmatpush3.bf16.msra.mxu0 %v831_v48 }
  0x38   :  { %771 = vmatprep.subr.bf16.mxu0 %v832_v49 }
  0x3b   :  { %772 = vmatpush3.bf16.msra.mxu0 %v833_v50 }
  0x3c   :  { %773 = vmatprep.subr.bf16.mxu0 %v834_v51 }
  0x3f   :  { %774 = vmatpush3.bf16.msra.mxu0 %v835_v52 }
  0x42   :  { %565 = vmatmul.mubr.bf16.vlgmr.msra.gmra.mrb[4].mxu0 %v836_v53 }
  0xf5   :  { %v731_v55 = vpop.f32.mrb[0].mxu0 }
  0xf6   :  { %v732_v57 = vpop.f32.mrb[1].mxu0 }
  0xf7   :  { %v733_v58 = vadd.f32 %v732_v57, %v731_v55  ;;  %v734_v59 = vpop.f32.mrb[2].mxu0  ;;  %v753_v60 = vpop.f32.mrb[0].mxu1 }
  0xf8   :  { %v735_v61 = vpop.f32.mrb[3].mxu0  ;;  %v754_v0 = vpop.f32.mrb[1].mxu1 }
  0xf9   :  { %v485_v62 = vadd.f32 %v733_v58, %v658_v56  ;;  %v736_v63 = vadd.f32 %v735_v61, %v734_v59  ;;  %v755_v1 = vadd.f32 %v754_v0, %v753_v60  ;;  %v756_v2 = vpop.f32.mrb[2].mxu1 }
  0xfa   :  { %v757_v4 = vpop.f32.mrb[3].mxu1 }
  0xfb   :  { %v488_v3 = vadd.f32 %v736_v63, %v658_v56  ;;  %v526_v5 = vadd.f32 %v755_v1, %v485_v62  ;;  %v758_v6 = vadd.f32 %v757_v4, %v756_v2 }
  0xfd   :  { %v529_v7 = vadd.f32 %v758_v6, %v488_v3 }
 0x115   :  { %v775_v8 = vpop.f32.mrb[4].mxu0 }
 0x116   :  { %v776_v9 = vpop.f32.mrb[5].mxu0 }
 0x117   :  { %v777_v10 = vadd.f32 %v776_v9, %v775_v8  ;;  %v778_v11 = vpop.f32.mrb[6].mxu0 }
 0x118   :  { %v779_v12 = vpop.f32.mrb[7].mxu0 }
 0x119   :  { %v567_v13 = vadd.f32 %v777_v10, %v526_v5  ;;  %v780_v14 = vadd.f32 %v779_v12, %v778_v11 }
 0x11b   :  { %v573_v16 = vmax.f32 %v567_v13, 0.0  ;;  %v570_v17 = vadd.f32 %v780_v14, %v529_v7 }
 0x11d   :  { %v574_v18 = vmax.f32 %v570_v17, 0.0  ;;  %v582_v19 = vmul.f32 %v713_v15, %v573_v16 }
 0x11f   :  { %v585_v20 = vsel %vm584_vm0, %v582_v19, 0.0  ;;  %v583_v21 = vmul.f32 %v713_v15, %v574_v18 }
 0x120   :  { %586 = vadd.xlane.f32.xlu0 %v585_v20 }
 0x121   :  { %v588_v22 = vsel %vm584_vm0, %v583_v21, 0.0 }
 0x124   :  { %589 = vadd.xlane.f32.xlu0 %v588_v22 }
 0x1ad   :  { %v587_v24 = vpop.xlane.xlu0 %586 }
 0x1ae   :  { %v598_v25 = vadd.f32 %v714_v23, %v587_v24 }
 0x1b0   :  { %v600_v26 = vand.u32 2147483647, %v598_v25  ;;  %vm614_vm1 = vcmp.ge.f32.partialorder %v598_v25, 0.0 }
 0x1b1   :  { %v590_v27 = vpop.xlane.xlu0 %589 }
 0x1b2   :  { %v602_v28 = vsub.f32 0.0, %v600_v26  ;;  %v599_v29 = vadd.f32 %v714_v23, %v590_v27 }
 0x1b4   :  { %v604_v30 = vmul.f32 1.442695, %v602_v28  ;;  %v601_v31 = vand.u32 2147483647, %v599_v29  ;;  %vm615_vm2 = vcmp.ge.f32.partialorder %v599_v29, 0.0 }
 0x1b6   :  { %839 = vpow2.f32 %v604_v30  ;;  %v603_v32 = vsub.f32 0.0, %v601_v31 }
 0x1b8   :  { %v606_v33 = vmul.f32 1.442695, %v603_v32 }
 0x1ba   :  { %841 = vpow2.f32 %v606_v33 }
 0x1c0   :  { %v840_v34 = vpop.eup %839 }
 0x1c1   :  { %v608_v35 = vadd.f32 1.0, %v840_v34 }
 0x1c3   :  { %843 = vrcp.f32 %v608_v35 }
 0x1c4   :  { %v842_v36 = vpop.eup %841 }
 0x1c5   :  { %v609_v37 = vadd.f32 1.0, %v842_v36 }
 0x1c7   :  { %845 = vrcp.f32 %v609_v37 }
 0x1cd   :  { %v844_v38 = vpop.eup %843 }
 0x1ce   :  { %v616_v39 = vsub.f32 1.0, %v844_v38 }
 0x1d0   :  { %v618_v40 = vsel %vm614_vm1, %v844_v38, %v616_v39 }
 0x1d1   :  { %v846_v41 = vpop.eup %845  ;;  %620 = vxpose.xlu1.b32.start [1/2] (short) (narrow) %v618_v40, 8 }
 0x1d2   :  { %v617_v42 = vsub.f32 1.0, %v846_v41 }
 0x1d4   :  { %v619_v43 = vsel %vm615_vm2, %v846_v41, %v617_v42 }
 0x1d5   :  { %621 = vxpose.xlu1.b32.end [2/2] (short) (narrow) %v619_v43, 8 }
 0x251   :  { %v636_v44 = vpop.trf.xlu1 }
 0x252   :  { %653 = vst.msk [vmem:[%s1056_s5] sm:$0x1] %vm652_vm3, %v636_v44 }

</bundles_post_ra>
